<compile_context>
chip_gen: v7x
topology: tpu7x:2x2x1
jax: 0.10.0
libtpu: 0.0.40
codegen_flags: <defaults>
</compile_context>

<pallas_src>
import functools

import jax
import jax.numpy as jnp
from jax.experimental import pallas as pl
from jax.experimental.pallas import tpu as pltpu


# ---------------------------------------------------------------------------
# Fused Pallas kernel: wavefront over stacked RNN layers + linear head
# ---------------------------------------------------------------------------
def _fused_rnn_kernel(x_ref, w_in_ref, w_blk_ref, b_all_ref, head_w_ref,
                      lin_b_ref, out_ref, *, T, bb, H, L, act):
    """Refs:
      x_ref      (1, T*bb, F)   time-major rows: row t*bb+j == x[batch j, time t]
      w_in_ref   (F, L*H)       [W_ih0 | 0 ... 0]
      w_blk_ref  (L*H, L*H)     block upper-bidiagonal: diag W_hh_l, super W_ih_{l+1}
      b_all_ref  (1, L*H)       [b0, b1, ..., b_{L-1}]  (b = b_ih + b_hh)
      head_w_ref (L, L*H, 1)    head_w[l] = lin_w with only rows [lH:(l+1)H] kept
      lin_b_ref  (1, 1)
      out_ref    (bb, 1)
    """
    LH = L * H
    x = x_ref[0]                                    # (T*bb, F)
    w_in = w_in_ref[...]                            # (F, LH)
    w_blk = w_blk_ref[...]                          # (LH, LH)
    b_all = b_all_ref[...]                          # (1, LH)

    # --- ONE flattened input-projection matmul for all timesteps + biases. ---
    # Row t*bb+j, block 0 = x_t @ W_ih0 + b0 ; blocks l>=1 = b_l (constant).
    proj = jnp.dot(x, w_in, preferred_element_type=jnp.float32) + b_all  # (T*bb, LH)

    if L > 1:
        lane = jax.lax.broadcasted_iota(jnp.int32, (bb, LH), 1)

    def step_add(s):
        # Additive term for wavefront step s (1-indexed, s <= T): static slice.
        p = proj[(s - 1) * bb: s * bb, :]
        if s < L:  # prologue: not-yet-active layer blocks must stay exactly 0
            p = jnp.where(lane < s * H, p, 0.0)
        return p

    # --- Wavefront step 1: h_{-1} carry is all zeros => skip the dead matmul.
    c = act(step_add(1))                            # (bb, LH)

    # --- Steady wavefront, fully unrolled; carry lives in vregs. ---
    for s in range(2, T + 1):
        c = act(jnp.dot(c, w_blk, preferred_element_type=jnp.float32) + step_add(s))

    # --- Linear head + epilogue wavefront steps (layers 1..L-1 finish). ---
    acc = jnp.broadcast_to(lin_b_ref[...], (bb, 1)).astype(jnp.float32)
    # After step T, carry block 0 == h0_T; head_w[0] is zero outside rows [0:H].
    acc = acc + jnp.dot(c, head_w_ref[0], preferred_element_type=jnp.float32)
    if L > 1:
        b_bb = jnp.broadcast_to(b_all, (bb, LH))
        for l in range(1, L):
            # Epilogue step T+l: block l becomes h_l at time T (lower blocks are
            # garbage but never feed a needed block and are masked by head_w[l]).
            c = act(jnp.dot(c, w_blk, preferred_element_type=jnp.float32) + b_bb)
            acc = acc + jnp.dot(c, head_w_ref[l], preferred_element_type=jnp.float32)
    out_ref[...] = acc


# ---------------------------------------------------------------------------
# Wrapper
# ---------------------------------------------------------------------------
def _num_tensorcores():
    """Best-effort TensorCore count; defaults to 1 (safe on v5e/v6e)."""
    try:
        dev = jax.devices()[0]
        for attr in ("num_cores", "core_count"):
            n = getattr(dev, attr, None)
            if isinstance(n, int) and n > 0:
                return n
    except Exception:
        pass
    return 1


def rnn_model_forward(x_btf, params, *, nonlinearity="tanh"):
    """x_btf: (B, T, F) batch-first, like the PyTorch module. Returns (B, 1)."""
    x = x_btf.astype(jnp.float32)
    B, T, F = x.shape
    layers = params["rnn"]
    L = len(layers)
    H = layers[0]["w_hh"].shape[0]
    LH = L * H

    # ---- Precompute fused weight blocks (tiny, one-time XLA work) ----
    w_in = jnp.zeros((F, LH), jnp.float32).at[:, :H].set(layers[0]["w_ih"])
    w_blk = jnp.zeros((LH, LH), jnp.float32)
    for l in range(L):
        w_blk = w_blk.at[l * H:(l + 1) * H, l * H:(l + 1) * H].set(layers[l]["w_hh"])
        if l + 1 < L:
            w_blk = w_blk.at[l * H:(l + 1) * H, (l + 1) * H:(l + 2) * H].set(
                layers[l + 1]["w_ih"])
    b_all = jnp.concatenate([layers[l]["b"] for l in range(L)], axis=1)     # (1, LH)
    lin_w = params["linear"]["w"]                                           # (LH, 1)
    head_w = jnp.stack(
        [jnp.zeros((LH, 1), jnp.float32)
         .at[l * H:(l + 1) * H, :].set(lin_w[l * H:(l + 1) * H, :])
         for l in range(L)], axis=0)                                        # (L, LH, 1)
    lin_b = params["linear"]["b"]                                           # (1, 1)

    # ---- Batch split only across real TensorCores (v7x); never on 1-TC chips.
    nb = 2 if (_num_tensorcores() >= 2 and B >= 16 and B % 16 == 0) else 1
    bb = B // nb

    # Time-major, batch-block-major input layout: x_tm[i, t*bb + j, :] ==
    # x[i*bb + j, t, :] -> one flattened projection dot in the kernel and
    # contiguous per-step row slices.
    x_tm = jnp.transpose(x, (1, 0, 2)).reshape(T, nb, bb, F)
    x_tm = jnp.transpose(x_tm, (1, 0, 2, 3)).reshape(nb, T * bb, F)

    act = jnp.tanh if nonlinearity == "tanh" else (lambda v: jnp.maximum(v, 0.0))
    kernel = functools.partial(_fused_rnn_kernel, T=T, bb=bb, H=H, L=L, act=act)

    def full_spec(a):
        zeros = (0,) * a.ndim
        return pl.BlockSpec(a.shape, lambda i, z=zeros: z)   # resident across grid

    in_specs = [
        pl.BlockSpec((1, T * bb, F), lambda i: (i, 0, 0)),
        full_spec(w_in), full_spec(w_blk), full_spec(b_all),
        full_spec(head_w), full_spec(lin_b),
    ]

    out = pl.pallas_call(
        kernel,
        out_shape=jax.ShapeDtypeStruct((B, 1), jnp.float32),
        grid=(nb,),
        in_specs=in_specs,
        out_specs=pl.BlockSpec((bb, 1), lambda i: (i, 0)),
        compiler_params=pltpu.CompilerParams(
            dimension_semantics=("parallel",),
        ),
    )(x_tm, w_in, w_blk, b_all, head_w, lin_b)
    return out


# ---------------------------------------------------------------------------
# Deterministic parameter init (mimics PyTorch U(-1/sqrt(H), 1/sqrt(H)))
# Weights stored pre-transposed vs PyTorch: w_ih (Din, H), w_hh (H, H),
# linear w (L*H, 1); b = b_ih + b_hh (equivalent for the RNN cell).
# ---------------------------------------------------------------------------
def init_params(key, input_size, hidden_size, num_layers, bias):
    k_rnn = 1.0 / jnp.sqrt(jnp.float32(hidden_size))
    layers = []
    for l in range(num_layers):
        din = input_size if l == 0 else hidden_size
        key, k1, k2, k3, k4 = jax.random.split(key, 5)
        w_ih = jax.random.uniform(k1, (din, hidden_size), jnp.float32, -k_rnn, k_rnn)
        w_hh = jax.random.uniform(k2, (hidden_size, hidden_size), jnp.float32, -k_rnn, k_rnn)
        if bias:
            b_ih = jax.random.uniform(k3, (1, hidden_size), jnp.float32, -k_rnn, k_rnn)
            b_hh = jax.random.uniform(k4, (1, hidden_size), jnp.float32, -k_rnn, k_rnn)
            b = b_ih + b_hh
        else:
            b = jnp.zeros((1, hidden_size), jnp.float32)
        layers.append({"w_ih": w_ih, "w_hh": w_hh, "b": b})

    in_features = num_layers * hidden_size
    k_lin = 1.0 / jnp.sqrt(jnp.float32(in_features))
    key, k1, k2 = jax.random.split(key, 3)
    lin_w = jax.random.uniform(k1, (in_features, 1), jnp.float32, -k_lin, k_lin)
    lin_b = jax.random.uniform(k2, (1, 1), jnp.float32, -k_lin, k_lin)
    return {"rnn": layers, "linear": {"w": lin_w, "b": lin_b}}


# ---------------------------------------------------------------------------
# Pure-JAX reference for verification
# ---------------------------------------------------------------------------
def reference_forward(x_btf, params, *, nonlinearity):
    act = jnp.tanh if nonlinearity == "tanh" else (lambda v: jnp.maximum(v, 0.0))
    x = jnp.transpose(x_btf, (1, 0, 2)).astype(jnp.float32)  # (T, B, F)
    T, B, _ = x.shape
    h_ns = []
    for layer in params["rnn"]:
        H = layer["w_hh"].shape[0]
        h = jnp.zeros((B, H), jnp.float32)
        outs = []
        for t in range(T):
            h = act(x[t] @ layer["w_ih"] + h @ layer["w_hh"] + layer["b"])
            outs.append(h)
        x = jnp.stack(outs, axis=0)
        h_ns.append(h)
        # TODO(synk): inter-layer dropout is training-mode only in nn.RNN;
        # inference semantics used here (and dropout=0.0 in the example).
    h_n = jnp.transpose(jnp.stack(h_ns, axis=0), (1, 0, 2)).reshape(B, -1)
    return h_n @ params["linear"]["w"] + params["linear"]["b"]


# ---------------------------------------------------------------------------
if __name__ == "__main__":
    batch, seq_len, input_size = 2, 8, 16
    hidden_size, num_layers = 32, 2
    nonlinearity, bias, dropout = "tanh", True, 0.0

    key = jax.random.PRNGKey(0)
    key, kx, kp = jax.random.split(key, 3)
    x = jax.random.normal(kx, (batch, seq_len, input_size), jnp.float32)
    params = init_params(kp, input_size, hidden_size, num_layers, bias)

    out = rnn_model_forward(x, params, nonlinearity=nonlinearity)
    out = jax.block_until_ready(out)
    assert out.shape == (batch, 1), out.shape

    ref = reference_forward(x, params, nonlinearity=nonlinearity)
    assert jnp.allclose(out, ref, atol=1e-4, rtol=1e-4), (out, ref)

    print("KERNEL_OK")
</pallas_src>

<mosaic_0001>
module attributes {stable_mosaic.version = 11 : i64} {
  func.func @_fused_rnn_kernel(%arg0: i32, %arg1: memref<1x16x16xf32, #tpu.memory_space<vmem>>, %arg2: memref<16x64xf32, #tpu.memory_space<vmem>>, %arg3: memref<64x64xf32, #tpu.memory_space<vmem>>, %arg4: memref<1x64xf32, #tpu.memory_space<vmem>>, %arg5: memref<2x64x1xf32, #tpu.memory_space<vmem>>, %arg6: memref<1x1xf32, #tpu.memory_space<vmem>>, %arg7: memref<2x1xf32, #tpu.memory_space<vmem>>) attributes {dimension_semantics = [#tpu.dimension_semantics<parallel>], iteration_bounds = array<i64: 1>, scalar_prefetch = 0 : i64, scratch_operands = 0 : i64, tpu.core_type = #tpu.core_type<tc>, window_params = [{transform_indices = @transform_0, window_bounds = array<i64: 1, 16, 16>}, {pipeline_mode = #tpu.pipeline_mode<synchronous>, transform_indices = @transform_1, window_bounds = array<i64: 16, 64>}, {pipeline_mode = #tpu.pipeline_mode<synchronous>, transform_indices = @transform_2, window_bounds = array<i64: 64, 64>}, {pipeline_mode = #tpu.pipeline_mode<synchronous>, transform_indices = @transform_3, window_bounds = array<i64: 1, 64>}, {pipeline_mode = #tpu.pipeline_mode<synchronous>, transform_indices = @transform_4, window_bounds = array<i64: 2, 64, 1>}, {pipeline_mode = #tpu.pipeline_mode<synchronous>, transform_indices = @transform_5, window_bounds = array<i64: 1, 1>}, {transform_indices = @transform_6, window_bounds = array<i64: 2, 1>}]} {
    %c0 = arith.constant 0 : index
    %c0_0 = arith.constant 0 : index
    %c0_1 = arith.constant 0 : index
    %0 = vector.load %arg1[%c0, %c0_0, %c0_1] : memref<1x16x16xf32, #tpu.memory_space<vmem>>, vector<1x16x16xf32>
    %1 = vector.shape_cast %0 : vector<1x16x16xf32> to vector<16x16xf32>
    %c0_2 = arith.constant 0 : index
    %c0_3 = arith.constant 0 : index
    %2 = vector.load %arg2[%c0_2, %c0_3] : memref<16x64xf32, #tpu.memory_space<vmem>>, vector<16x64xf32>
    %c0_4 = arith.constant 0 : index
    %c0_5 = arith.constant 0 : index
    %3 = vector.load %arg3[%c0_4, %c0_5] : memref<64x64xf32, #tpu.memory_space<vmem>>, vector<64x64xf32>
    %c0_6 = arith.constant 0 : index
    %c0_7 = arith.constant 0 : index
    %4 = vector.load %arg4[%c0_6, %c0_7] : memref<1x64xf32, #tpu.memory_space<vmem>>, vector<1x64xf32>
    %cst = arith.constant dense<0.000000e+00> : vector<16x64xf32>
    %5 = tpu.matmul %1, %2, %cst {dimension_numbers = #tpu.dot_dimension_numbers<[1], [0], [0], [1], [0, 0, 1, 1], [], []>} : vector<16x16xf32>, vector<16x64xf32>, vector<16x64xf32> -> vector<16x64xf32>
    %6 = vector.broadcast %4 : vector<1x64xf32> to vector<16x64xf32>
    %7 = arith.addf %5, %6 : vector<16x64xf32>
    %8 = tpu.iota {dimensions = array<i32: 1>} : vector<2x64xi32>
    %9 = vector.extract_strided_slice %7 {offsets = [0, 0], sizes = [2, 64], strides = [1, 1]} : vector<16x64xf32> to vector<2x64xf32>
    %c32_i32 = arith.constant 32 : i32
    %10 = vector.broadcast %c32_i32 : i32 to vector<2x64xi32>
    %11 = arith.cmpi slt, %8, %10 : vector<2x64xi32>
    %cst_8 = arith.constant 0.000000e+00 : f32
    %12 = vector.broadcast %cst_8 : f32 to vector<2x64xf32>
    %13 = arith.select %11, %9, %12 : vector<2x64xi1>, vector<2x64xf32>
    %14 = math.tanh %13 : vector<2x64xf32>
    %cst_9 = arith.constant dense<0.000000e+00> : vector<2x64xf32>
    %15 = tpu.matmul %14, %3, %cst_9 {dimension_numbers = #tpu.dot_dimension_numbers<[1], [0], [0], [1], [0, 0, 1, 1], [], []>} : vector<2x64xf32>, vector<64x64xf32>, vector<2x64xf32> -> vector<2x64xf32>
    %16 = vector.extract_strided_slice %7 {offsets = [2, 0], sizes = [2, 64], strides = [1, 1]} : vector<16x64xf32> to vector<2x64xf32>
    %17 = arith.addf %15, %16 : vector<2x64xf32>
    %18 = math.tanh %17 : vector<2x64xf32>
    %cst_10 = arith.constant dense<0.000000e+00> : vector<2x64xf32>
    %19 = tpu.matmul %18, %3, %cst_10 {dimension_numbers = #tpu.dot_dimension_numbers<[1], [0], [0], [1], [0, 0, 1, 1], [], []>} : vector<2x64xf32>, vector<64x64xf32>, vector<2x64xf32> -> vector<2x64xf32>
    %20 = vector.extract_strided_slice %7 {offsets = [4, 0], sizes = [2, 64], strides = [1, 1]} : vector<16x64xf32> to vector<2x64xf32>
    %21 = arith.addf %19, %20 : vector<2x64xf32>
    %22 = math.tanh %21 : vector<2x64xf32>
    %cst_11 = arith.constant dense<0.000000e+00> : vector<2x64xf32>
    %23 = tpu.matmul %22, %3, %cst_11 {dimension_numbers = #tpu.dot_dimension_numbers<[1], [0], [0], [1], [0, 0, 1, 1], [], []>} : vector<2x64xf32>, vector<64x64xf32>, vector<2x64xf32> -> vector<2x64xf32>
    %24 = vector.extract_strided_slice %7 {offsets = [6, 0], sizes = [2, 64], strides = [1, 1]} : vector<16x64xf32> to vector<2x64xf32>
    %25 = arith.addf %23, %24 : vector<2x64xf32>
    %26 = math.tanh %25 : vector<2x64xf32>
    %cst_12 = arith.constant dense<0.000000e+00> : vector<2x64xf32>
    %27 = tpu.matmul %26, %3, %cst_12 {dimension_numbers = #tpu.dot_dimension_numbers<[1], [0], [0], [1], [0, 0, 1, 1], [], []>} : vector<2x64xf32>, vector<64x64xf32>, vector<2x64xf32> -> vector<2x64xf32>
    %28 = vector.extract_strided_slice %7 {offsets = [8, 0], sizes = [2, 64], strides = [1, 1]} : vector<16x64xf32> to vector<2x64xf32>
    %29 = arith.addf %27, %28 : vector<2x64xf32>
    %30 = math.tanh %29 : vector<2x64xf32>
    %cst_13 = arith.constant dense<0.000000e+00> : vector<2x64xf32>
    %31 = tpu.matmul %30, %3, %cst_13 {dimension_numbers = #tpu.dot_dimension_numbers<[1], [0], [0], [1], [0, 0, 1, 1], [], []>} : vector<2x64xf32>, vector<64x64xf32>, vector<2x64xf32> -> vector<2x64xf32>
    %32 = vector.extract_strided_slice %7 {offsets = [10, 0], sizes = [2, 64], strides = [1, 1]} : vector<16x64xf32> to vector<2x64xf32>
    %33 = arith.addf %31, %32 : vector<2x64xf32>
    %34 = math.tanh %33 : vector<2x64xf32>
    %cst_14 = arith.constant dense<0.000000e+00> : vector<2x64xf32>
    %35 = tpu.matmul %34, %3, %cst_14 {dimension_numbers = #tpu.dot_dimension_numbers<[1], [0], [0], [1], [0, 0, 1, 1], [], []>} : vector<2x64xf32>, vector<64x64xf32>, vector<2x64xf32> -> vector<2x64xf32>
    %36 = vector.extract_strided_slice %7 {offsets = [12, 0], sizes = [2, 64], strides = [1, 1]} : vector<16x64xf32> to vector<2x64xf32>
    %37 = arith.addf %35, %36 : vector<2x64xf32>
    %38 = math.tanh %37 : vector<2x64xf32>
    %cst_15 = arith.constant dense<0.000000e+00> : vector<2x64xf32>
    %39 = tpu.matmul %38, %3, %cst_15 {dimension_numbers = #tpu.dot_dimension_numbers<[1], [0], [0], [1], [0, 0, 1, 1], [], []>} : vector<2x64xf32>, vector<64x64xf32>, vector<2x64xf32> -> vector<2x64xf32>
    %40 = vector.extract_strided_slice %7 {offsets = [14, 0], sizes = [2, 64], strides = [1, 1]} : vector<16x64xf32> to vector<2x64xf32>
    %41 = arith.addf %39, %40 : vector<2x64xf32>
    %42 = math.tanh %41 : vector<2x64xf32>
    %c0_16 = arith.constant 0 : index
    %c0_17 = arith.constant 0 : index
    %43 = vector.load %arg6[%c0_16, %c0_17] : memref<1x1xf32, #tpu.memory_space<vmem>>, vector<1x1xf32>
    %44 = vector.shape_cast %43 : vector<1x1xf32> to vector<1x1xf32>
    %45 = vector.broadcast %44 : vector<1x1xf32> to vector<2x1xf32>
    %c0_18 = arith.constant 0 : index
    %c0_19 = arith.constant 0 : index
    %c0_20 = arith.constant 0 : index
    %46 = vector.load %arg5[%c0_18, %c0_19, %c0_20] : memref<2x64x1xf32, #tpu.memory_space<vmem>>, vector<1x64x1xf32>
    %47 = vector.shape_cast %46 : vector<1x64x1xf32> to vector<64x1xf32>
    %cst_21 = arith.constant dense<0.000000e+00> : vector<2x1xf32>
    %48 = tpu.matmul %42, %47, %cst_21 {dimension_numbers = #tpu.dot_dimension_numbers<[1], [0], [0], [1], [0, 0, 1, 1], [], []>} : vector<2x64xf32>, vector<64x1xf32>, vector<2x1xf32> -> vector<2x1xf32>
    %49 = arith.addf %45, %48 : vector<2x1xf32>
    %50 = vector.shape_cast %4 : vector<1x64xf32> to vector<1x64xf32>
    %51 = vector.broadcast %50 : vector<1x64xf32> to vector<2x64xf32>
    %cst_22 = arith.constant dense<0.000000e+00> : vector<2x64xf32>
    %52 = tpu.matmul %42, %3, %cst_22 {dimension_numbers = #tpu.dot_dimension_numbers<[1], [0], [0], [1], [0, 0, 1, 1], [], []>} : vector<2x64xf32>, vector<64x64xf32>, vector<2x64xf32> -> vector<2x64xf32>
    %53 = arith.addf %52, %51 : vector<2x64xf32>
    %54 = math.tanh %53 : vector<2x64xf32>
    %c1 = arith.constant 1 : index
    %c0_23 = arith.constant 0 : index
    %c0_24 = arith.constant 0 : index
    %55 = vector.load %arg5[%c1, %c0_23, %c0_24] : memref<2x64x1xf32, #tpu.memory_space<vmem>>, vector<1x64x1xf32>
    %56 = vector.shape_cast %55 : vector<1x64x1xf32> to vector<64x1xf32>
    %cst_25 = arith.constant dense<0.000000e+00> : vector<2x1xf32>
    %57 = tpu.matmul %54, %56, %cst_25 {dimension_numbers = #tpu.dot_dimension_numbers<[1], [0], [0], [1], [0, 0, 1, 1], [], []>} : vector<2x64xf32>, vector<64x1xf32>, vector<2x1xf32> -> vector<2x1xf32>
    %58 = arith.addf %49, %57 : vector<2x1xf32>
    %c0_26 = arith.constant 0 : index
    %c0_27 = arith.constant 0 : index
    %59 = vector.load %arg7[%c0_26, %c0_27] : memref<2x1xf32, #tpu.memory_space<vmem>>, vector<2x1xf32>
    tpu.vector_store %arg7[%c0_26, %c0_27], %58 {strides = array<i32>} : memref<2x1xf32, #tpu.memory_space<vmem>>, vector<2x1xf32>,
    return
  }
  func.func @transform_0(%arg0: i32) -> (i32, i32, i32) {
    %c0_i32 = arith.constant 0 : i32
    %c0_i32_0 = arith.constant 0 : i32
    %c0_i32_1 = arith.constant 0 : i32
    return %arg0, %c0_i32, %c0_i32_0 : i32, i32, i32
  }
  func.func @transform_1(%arg0: i32) -> (i32, i32) {
    %c0_i32 = arith.constant 0 : i32
    %c0_i32_0 = arith.constant 0 : i32
    %c0_i32_1 = arith.constant 0 : i32
    return %c0_i32, %c0_i32_0 : i32, i32
  }
  func.func @transform_2(%arg0: i32) -> (i32, i32) {
    %c0_i32 = arith.constant 0 : i32
    %c0_i32_0 = arith.constant 0 : i32
    %c0_i32_1 = arith.constant 0 : i32
    return %c0_i32, %c0_i32_0 : i32, i32
  }
  func.func @transform_3(%arg0: i32) -> (i32, i32) {
    %c0_i32 = arith.constant 0 : i32
    %c0_i32_0 = arith.constant 0 : i32
    %c0_i32_1 = arith.constant 0 : i32
    return %c0_i32, %c0_i32_0 : i32, i32
  }
  func.func @transform_4(%arg0: i32) -> (i32, i32, i32) {
    %c0_i32 = arith.constant 0 : i32
    %c0_i32_0 = arith.constant 0 : i32
    %c0_i32_1 = arith.constant 0 : i32
    %c0_i32_2 = arith.constant 0 : i32
    return %c0_i32, %c0_i32_0, %c0_i32_1 : i32, i32, i32
  }
  func.func @transform_5(%arg0: i32) -> (i32, i32) {
    %c0_i32 = arith.constant 0 : i32
    %c0_i32_0 = arith.constant 0 : i32
    %c0_i32_1 = arith.constant 0 : i32
    return %c0_i32, %c0_i32_0 : i32, i32
  }
  func.func @transform_6(%arg0: i32) -> (i32, i32) {
    %c0_i32 = arith.constant 0 : i32
    %c0_i32_0 = arith.constant 0 : i32
    return %arg0, %c0_i32 : i32, i32
  }
}

</mosaic_0001>

<bundles_post_ra>
// kernel: tpu_custom_call.1
= control target key start
LH: loop header
LB: loop body
LE: loop exit
PB: predicated region body
PF: predicated region fallthrough
CT: control target
= control target key end

     0   :  { %vm44_vm0 = vcmask 130048   ;;  %v1374_v8 = vmov 0.0|0.0   ;;  %vm1375_vm1 = vmmov 0   ;;  %v1376_v17 = vmov 0.0   ;;  %s1629_s1 = inlined_call_operand.vmem [shape: f32[16,64], index: 1, kind: input, shape index: {}]   ;;  %s1630_s0 = inlined_call_operand.vmem [shape: f32[1,16,16], index: 0, kind: input, shape index: {}]   ;;  %s1631_s2 = inlined_call_operand.vmem [shape: f32[64,64], index: 2, kind: input, shape index: {}]   ;;  %s1632_s3 = inlined_call_operand.vmem [shape: f32[1,64], index: 3, kind: input, shape index: {}]   ;;  %s1633_s4 = inlined_call_operand.vmem [shape: f32[2,64,1], index: 4, kind: input, shape index: {}]   ;;  %s1634_s5 = inlined_call_operand.<no memory space> [shape: f32[1,1], index: 5, kind: input, shape index: {}]   ;;  %s1635_s6 = inlined_call_operand.vmem [shape: f32[2,1], index: 6, kind: output, shape index: {}]  }
   0x1   :  { %v27_v0 = vld [vmem:[%s1629_s1] sm:$0xff]  ;;  %v28_v1 = vld [vmem:[%s1629_s1 + $0x8] sm:$0xff]  ;;  %1230 = vmatprep.subr.bf16.mxu1 %v1374_v8  ;;  %v31_v9 = vld [vmem:[%s1631_s2 + $0x10] sm:$0xff]  ;;  %1052 = vmatprep.mubr.msk.f32.mxu1 %vm1375_vm1, %v1376_v17  ;;  %v126_v19 = vlaneseq  ;;  %vm134_vm3 = vcmask 523264   ;;  %vm907_vm4 = vcmask 1024  }
   0x2   :  { %v25_v2 = vld [vmem:[%s1630_s0] sm:$0xff]  ;;  %v1226_v3 = vpack.c.bf16 %v28_v1, %v27_v0  ;;  %v26_v4 = vld [vmem:[%s1630_s0 + $0x8] sm:$0xff]  ;;  %v32_v10 = vld [vmem:[%s1631_s2 + $0x18] sm:$0xff] }
   0x3   :  { %1033 = vmatprep.mubr.msk.f32.mxu0 %vm44_vm0, %v25_v2  ;;  %v29_v5 = vld [vmem:[%s1631_s2] sm:$0xff]  ;;  %v30_v6 = vld [vmem:[%s1631_s2 + $0x8] sm:$0xff]  ;;  %v1444_v11 = vpack.c.bf16 %v32_v10, %v31_v9  ;;  %v35_v15 = vld [vmem:[%s1631_s2 + $0x30] sm:$0xff]  ;;  %v127_v20 = vand.u32 127, %v126_v19 }
   0x4   :  { %1227 = vmatprep.subr.bf16.mxu0 %v1226_v3  ;;  %v1430_v7 = vpack.c.bf16 %v30_v6, %v29_v5  ;;  %v33_v12 = vld [vmem:[%s1631_s2 + $0x20] sm:$0xff]  ;;  %v34_v13 = vld [vmem:[%s1631_s2 + $0x28] sm:$0xff]  ;;  %v36_v16 = vld [vmem:[%s1631_s2 + $0x38] sm:$0xff] }
   0x5   :  { %1229 = vmatpush3.bf16.msra.mxu0 %v1226_v3  ;;  %v1455_v14 = vpack.c.bf16 %v34_v13, %v33_v12  ;;  %v1469_v18 = vpack.c.bf16 %v36_v16, %v35_v15  ;;  %v1481_v21 = vld [vmem:[%s1632_s3] ss:$0 sm:$0xff]  ;;  %vm128_vm2 = vcmp.lt.s32.totalorder %v127_v20, 32  ;;  %v672_v53 = vld [vmem:[%s1633_s4 + $0x8] sm:$0xff]  ;;  %v673_v60 = vld [vmem:[%s1633_s4 + $0x10] sm:$0xff] }
   0x6   :  { %1242 = vmatprep.subr.bf16.mxu0 %v1374_v8  ;;  %1232 = vmatpush3.bf16.msra.mxu1 %v1430_v7  ;;  %v671_v52 = vld [vmem:[%s1633_s4] sm:$0xff]  ;;  %v674_v61 = vld [vmem:[%s1633_s4 + $0x18] sm:$0xff]  ;;  %v676_v0 = vld [vmem:[%s1633_s4 + $0x28] sm:$0xff] }
   0x7   :  { %1233 = vmatprep.subr.bf16.mxu1 %v1374_v8  ;;  %v1315_v54 = vpack.c.bf16 %v672_v53, %v671_v52  ;;  %v1318_v62 = vpack.c.bf16 %v674_v61, %v673_v60  ;;  %v675_v63 = vld [vmem:[%s1633_s4 + $0x20] sm:$0xff]  ;;  %v677_v2 = vld [vmem:[%s1633_s4 + $0x30] sm:$0xff]  ;;  %v678_v3 = vld [vmem:[%s1633_s4 + $0x38] sm:$0xff] }
   0x8   :  { %1034 = vmatmul.mubr.msk.f32.vlgmr.msra.gmra.mrb[0].mxu0 %vm44_vm0, %v26_v4  ;;  %v1321_v1 = vpack.c.bf16 %v676_v0, %v675_v63  ;;  %v1324_v4 = vpack.c.bf16 %v678_v3, %v677_v2  ;;  %v926_v10 = vld [vmem:[%s1633_s4 + $0x40] sm:$0xff]  ;;  %v929_v15 = vld [vmem:[%s1633_s4 + $0x58] sm:$0xff]  ;;  %v932_v20 = vld [vmem:[%s1633_s4 + $0x70] sm:$0xff] }
   0x9   :  { %1244 = vmatpush3.bf16.msra.mxu0 %v1430_v7  ;;  %1071 = vmatprep.mubr.msk.f32.mxu0 %vm1375_vm1, %v1376_v17 }
   0xa   :  { %1245 = vmatprep.subr.bf16.mxu0 %v1374_v8  ;;  %1235 = vmatpush3.bf16.msra.mxu1 %v1444_v11 }
   0xb   :  { %1236 = vmatprep.subr.bf16.mxu1 %v1374_v8 }
   0xd   :  { %1247 = vmatpush3.bf16.msra.mxu0 %v1444_v11 }
   0xe   :  { %1248 = vmatprep.subr.bf16.mxu0 %v1374_v8  ;;  %1238 = vmatpush3.bf16.msra.mxu1 %v1455_v14 }
   0xf   :  { %1239 = vmatprep.subr.bf16.mxu1 %v1374_v8 }
  0x11   :  { %1250 = vmatpush3.bf16.msra.mxu0 %v1455_v14 }
  0x12   :  { %1251 = vmatprep.subr.bf16.mxu0 %v1374_v8  ;;  %1241 = vmatpush3.bf16.msra.mxu1 %v1469_v18 }
  0x13   :  { %1254 = vmatprep.subr.bf16.mxu1 %v1374_v8 }
  0x15   :  { %1253 = vmatpush3.bf16.msra.mxu0 %v1469_v18 }
  0x16   :  { %1266 = vmatprep.subr.bf16.mxu0 %v1374_v8 }
  0xdb   :  { %v1483_v22 = vpop.f32.mrb[0].mxu0 }
  0xdc   :  { %v117_v23 = vpop.f32.mrb[1].mxu0  ;;  %v1532_v42 = vadd.f32 %v1483_v22, %v1481_v21  ;;  %v933_v22 = vld [vmem:[%s1633_s4 + $0x78] sm:$0xff] }
  0xdd   :  { %v118_v24 = vadd.f32 %v1481_v21, %v117_v23  ;;  %v1348_v23 = vpack.c.bf16 %v933_v22, %v932_v20 }
  0xde   :  { %v436_v47 = vrot.slane %v1532_v42, 2  ;;  %v512_v55 = vrot.slane %v1532_v42, 4  ;;  %v588_v5 = vrot.slane %v1532_v42, 6 }
  0xdf   :  { %v129_v25 = vsel %vm128_vm2, %v118_v24, 0.0  ;;  %v132_v27 = vrot.slane %v118_v24, 2  ;;  %v209_v32 = vrot.slane %v118_v24, 4  ;;  %v285_v37 = vrot.slane %v118_v24, 6 }
  0xe0   :  { %1356 = vtanh.f32 %v129_v25  ;;  %v11_v24 = vstv %s1634_s5 }
  0xe1   :  { %12 = vst [vmem:[#allocation2] sm:$0x1] %v11_v24 }
  0xea   :  { %v1357_v26 = vpop.eup %1356 }
  0xeb   :  { %1053 = vmatmul.mubr.msk.f32.vlgmr.msra.gmra.mrb[0].mxu1 %vm134_vm3, %v1357_v26 }
  0xec   :  { %1256 = vmatpush3.bf16.msra.mxu1 %v1430_v7  ;;  %1090 = vmatprep.mubr.msk.f32.mxu1 %vm1375_vm1, %v1376_v17 }
  0xed   :  { %1257 = vmatprep.subr.bf16.mxu1 %v1374_v8 }
  0xf0   :  { %1259 = vmatpush3.bf16.msra.mxu1 %v1444_v11 }
  0xf1   :  { %1260 = vmatprep.subr.bf16.mxu1 %v1374_v8 }
  0xf4   :  { %1262 = vmatpush3.bf16.msra.mxu1 %v1455_v14 }
  0xf5   :  { %1263 = vmatprep.subr.bf16.mxu1 %v1374_v8 }
  0xf8   :  { %1265 = vmatpush3.bf16.msra.mxu1 %v1469_v18 }
  0xf9   :  { %1278 = vmatprep.subr.bf16.mxu1 %v1374_v8 }
 0x1be   :  { %v204_v28 = vpop.f32.mrb[0].mxu1 }
 0x1bf   :  { %v205_v29 = vadd.f32 %v204_v28, %v132_v27  ;;  %v1054_v30 = vpop.f32.mrb[1].mxu1 }
 0x1c1   :  { %1358 = vtanh.f32 %v205_v29  ;;  %v923_v29 = vld [vmem:[#allocation2] ss:$0 sm:$0xff] }
 0x1cb   :  { %v1359_v31 = vpop.eup %1358 }
 0x1cc   :  { %1072 = vmatmul.mubr.msk.f32.vlgmr.msra.gmra.mrb[2].mxu0 %vm134_vm3, %v1359_v31 }
 0x1cd   :  { %1268 = vmatpush3.bf16.msra.mxu0 %v1430_v7  ;;  %1109 = vmatprep.mubr.msk.f32.mxu0 %vm1375_vm1, %v1376_v17 }
 0x1ce   :  { %1269 = vmatprep.subr.bf16.mxu0 %v1374_v8 }
 0x1d1   :  { %1271 = vmatpush3.bf16.msra.mxu0 %v1444_v11 }
 0x1d2   :  { %1272 = vmatprep.subr.bf16.mxu0 %v1374_v8 }
 0x1d5   :  { %1274 = vmatpush3.bf16.msra.mxu0 %v1455_v14 }
 0x1d6   :  { %1275 = vmatprep.subr.bf16.mxu0 %v1374_v8 }
 0x1d9   :  { %1277 = vmatpush3.bf16.msra.mxu0 %v1469_v18 }
 0x1da   :  { %1290 = vmatprep.subr.bf16.mxu0 %v1374_v8 }
 0x29f   :  { %v280_v33 = vpop.f32.mrb[2].mxu0 }
 0x2a0   :  { %v281_v34 = vadd.f32 %v280_v33, %v209_v32  ;;  %v1073_v35 = vpop.f32.mrb[3].mxu0 }
 0x2a2   :  { %1360 = vtanh.f32 %v281_v34 }
 0x2ac   :  { %v1361_v36 = vpop.eup %1360 }
 0x2ad   :  { %1091 = vmatmul.mubr.msk.f32.vlgmr.msra.gmra.mrb[2].mxu1 %vm134_vm3, %v1361_v36 }
 0x2ae   :  { %1280 = vmatpush3.bf16.msra.mxu1 %v1430_v7  ;;  %1128 = vmatprep.mubr.msk.f32.mxu1 %vm1375_vm1, %v1376_v17 }
 0x2af   :  { %1281 = vmatprep.subr.bf16.mxu1 %v1374_v8 }
 0x2b2   :  { %1283 = vmatpush3.bf16.msra.mxu1 %v1444_v11 }
 0x2b3   :  { %1284 = vmatprep.subr.bf16.mxu1 %v1374_v8 }
 0x2b6   :  { %1286 = vmatpush3.bf16.msra.mxu1 %v1455_v14 }
 0x2b7   :  { %1287 = vmatprep.subr.bf16.mxu1 %v1374_v8 }
 0x2ba   :  { %1289 = vmatpush3.bf16.msra.mxu1 %v1469_v18 }
 0x2bb   :  { %1302 = vmatprep.subr.bf16.mxu1 %v1374_v8 }
 0x380   :  { %v356_v38 = vpop.f32.mrb[2].mxu1 }
 0x381   :  { %v357_v39 = vadd.f32 %v356_v38, %v285_v37  ;;  %v1092_v40 = vpop.f32.mrb[3].mxu1 }
 0x383   :  { %1362 = vtanh.f32 %v357_v39 }
 0x38d   :  { %v1363_v41 = vpop.eup %1362 }
 0x38e   :  { %1110 = vmatmul.mubr.msk.f32.vlgmr.msra.gmra.mrb[4].mxu0 %vm134_vm3, %v1363_v41 }
 0x38f   :  { %1292 = vmatpush3.bf16.msra.mxu0 %v1430_v7  ;;  %1147 = vmatprep.mubr.msk.f32.mxu0 %vm1375_vm1, %v1376_v17 }
 0x390   :  { %1293 = vmatprep.subr.bf16.mxu0 %v1374_v8 }
 0x393   :  { %1295 = vmatpush3.bf16.msra.mxu0 %v1444_v11 }
 0x394   :  { %1296 = vmatprep.subr.bf16.mxu0 %v1374_v8 }
 0x397   :  { %1298 = vmatpush3.bf16.msra.mxu0 %v1455_v14 }
 0x398   :  { %1299 = vmatprep.subr.bf16.mxu0 %v1374_v8 }
 0x39b   :  { %1301 = vmatpush3.bf16.msra.mxu0 %v1469_v18 }
 0x39c   :  { %1314 = vmatprep.subr.bf16.mxu0 %v1374_v8 }
 0x461   :  { %v430_v43 = vpop.f32.mrb[4].mxu0 }
 0x462   :  { %v431_v44 = vadd.f32 %v430_v43, %v1532_v42  ;;  %v1111_v45 = vpop.f32.mrb[5].mxu0 }
 0x464   :  { %1364 = vtanh.f32 %v431_v44 }
 0x46e   :  { %v1365_v46 = vpop.eup %1364 }
 0x46f   :  { %1129 = vmatmul.mubr.msk.f32.vlgmr.msra.gmra.mrb[4].mxu1 %vm134_vm3, %v1365_v46 }
 0x470   :  { %1304 = vmatpush3.bf16.msra.mxu1 %v1430_v7  ;;  %1166 = vmatprep.mubr.msk.f32.mxu1 %vm1375_vm1, %v1376_v17 }
 0x471   :  { %1305 = vmatprep.subr.bf16.mxu1 %v1374_v8 }
 0x474   :  { %1307 = vmatpush3.bf16.msra.mxu1 %v1444_v11 }
 0x475   :  { %1308 = vmatprep.subr.bf16.mxu1 %v1374_v8 }
 0x478   :  { %1310 = vmatpush3.bf16.msra.mxu1 %v1455_v14 }
 0x479   :  { %1311 = vmatprep.subr.bf16.mxu1 %v1374_v8 }
 0x47c   :  { %1313 = vmatpush3.bf16.msra.mxu1 %v1469_v18 }
 0x47d   :  { %1326 = vmatprep.subr.bf16.mxu1 %v1374_v8 }
 0x542   :  { %v507_v48 = vpop.f32.mrb[4].mxu1 }
 0x543   :  { %v508_v49 = vadd.f32 %v507_v48, %v436_v47  ;;  %v1130_v50 = vpop.f32.mrb[5].mxu1 }
 0x545   :  { %1366 = vtanh.f32 %v508_v49 }
 0x54f   :  { %v1367_v51 = vpop.eup %1366 }
 0x550   :  { %1148 = vmatmul.mubr.msk.f32.vlgmr.msra.gmra.mrb[6].mxu0 %vm134_vm3, %v1367_v51 }
 0x551   :  { %1185 = vmatprep.mubr.msk.f32.mxu0 %vm1375_vm1, %v1376_v17  ;;  %1316 = vmatpush3.bf16.msra.mxu0 %v1315_v54 }
 0x552   :  { %1317 = vmatprep.subr.bf16.mxu0 %v1374_v8 }
 0x555   :  { %1319 = vmatpush3.bf16.msra.mxu0 %v1318_v62 }
 0x556   :  { %1320 = vmatprep.subr.bf16.mxu0 %v1374_v8 }
 0x559   :  { %1322 = vmatpush3.bf16.msra.mxu0 %v1321_v1 }
 0x55a   :  { %1323 = vmatprep.subr.bf16.mxu0 %v1374_v8 }
 0x55d   :  { %1325 = vmatpush3.bf16.msra.mxu0 %v1324_v4 }
 0x55e   :  { %1338 = vmatprep.subr.bf16.mxu0 %v1374_v8 }
 0x623   :  { %v583_v56 = vpop.f32.mrb[6].mxu0 }
 0x624   :  { %v584_v57 = vadd.f32 %v583_v56, %v512_v55  ;;  %v1149_v58 = vpop.f32.mrb[7].mxu0 }
 0x626   :  { %1368 = vtanh.f32 %v584_v57 }
 0x630   :  { %v1369_v59 = vpop.eup %1368 }
 0x631   :  { %1167 = vmatmul.mubr.msk.f32.vlgmr.msra.gmra.mrb[6].mxu1 %vm134_vm3, %v1369_v59 }
 0x632   :  { %1328 = vmatpush3.bf16.msra.mxu1 %v1430_v7  ;;  %1204 = vmatprep.mubr.msk.f32.mxu1 %vm1375_vm1, %v1376_v17 }
 0x633   :  { %1329 = vmatprep.subr.bf16.mxu1 %v1374_v8 }
 0x636   :  { %1331 = vmatpush3.bf16.msra.mxu1 %v1444_v11  ;;  %v927_v11 = vld [vmem:[%s1633_s4 + $0x48] sm:$0xff] }
 0x637   :  { %1332 = vmatprep.subr.bf16.mxu1 %v1374_v8  ;;  %v1339_v12 = vpack.c.bf16 %v927_v11, %v926_v10 }
 0x63a   :  { %1334 = vmatpush3.bf16.msra.mxu1 %v1455_v14  ;;  %v928_v14 = vld [vmem:[%s1633_s4 + $0x50] sm:$0xff] }
 0x63b   :  { %1335 = vmatprep.subr.bf16.mxu1 %v1374_v8  ;;  %v1342_v16 = vpack.c.bf16 %v929_v15, %v928_v14 }
 0x63e   :  { %1337 = vmatpush3.bf16.msra.mxu1 %v1469_v18  ;;  %v930_v18 = vld [vmem:[%s1633_s4 + $0x60] sm:$0xff] }
 0x704   :  { %v659_v6 = vpop.f32.mrb[6].mxu1 }
 0x705   :  { %v660_v7 = vadd.f32 %v659_v6, %v588_v5  ;;  %v1168_v9 = vpop.f32.mrb[7].mxu1 }
 0x707   :  { %1370 = vtanh.f32 %v660_v7 }
 0x711   :  { %v1371_v13 = vpop.eup %1370 }
 0x712   :  { %1186 = vmatmul.mubr.msk.f32.vlgmr.msra.gmra.mrb[8].mxu0 %vm134_vm3, %v1371_v13  ;;  %1205 = vmatmul.mubr.msk.f32.vlgmr.msra.gmra.mrb[8].mxu1 %vm134_vm3, %v1371_v13 }
 0x713   :  { %1340 = vmatpush3.bf16.msra.mxu0 %v1339_v12  ;;  %1223 = vmatprep.mubr.msk.f32.mxu0 %vm1375_vm1, %v1376_v17  ;;  %v931_v17 = vld [vmem:[%s1633_s4 + $0x68] sm:$0xff] }
 0x714   :  { %1341 = vmatprep.subr.bf16.mxu0 %v1374_v8  ;;  %v1345_v19 = vpack.c.bf16 %v931_v17, %v930_v18 }
 0x717   :  { %1343 = vmatpush3.bf16.msra.mxu0 %v1342_v16 }
 0x718   :  { %1344 = vmatprep.subr.bf16.mxu0 %v1374_v8 }
 0x71b   :  { %1346 = vmatpush3.bf16.msra.mxu0 %v1345_v19 }
 0x71c   :  { %1347 = vmatprep.subr.bf16.mxu0 %v1374_v8 }
 0x71f   :  { %1349 = vmatpush3.bf16.msra.mxu0 %v1348_v23 }
 0x7e5   :  { %v819_v25 = vpop.f32.mrb[8].mxu1 }
 0x7e6   :  { %v820_v26 = vadd.f32 %v1481_v21, %v819_v25  ;;  %v1206_v27 = vpop.f32.mrb[9].mxu1 }
 0x7e8   :  { %1372 = vtanh.f32 %v820_v26 }
 0x7f2   :  { %v1373_v28 = vpop.eup %1372 }
 0x7f3   :  { %1224 = vmatmul.mubr.msk.f32.vlgmr.msra.gmra.mrb[8].mxu0 %vm134_vm3, %v1373_v28 }
 0x8c6   :  { %v902_v30 = vpop.f32.mrb[8].mxu0 }
 0x8c7   :  { %v1350_v31 = vadd.f32 %v923_v29, %v902_v30  ;;  %v1225_v32 = vpop.f32.mrb[9].mxu0 }
 0x8c9   :  { %908 = vst.msk [vmem:[%s1635_s6] sm:$0x3] %vm907_vm4, %v1350_v31 }

</bundles_post_ra>
